<compile_context>
chip_gen: v7x
topology: tpu7x:2x2x1
jax: 0.10.0
libtpu: 0.0.40
codegen_flags: <defaults>
</compile_context>

<pallas_src>
import functools

import jax
import jax.numpy as jnp
from jax.experimental import pallas as pl
from jax.experimental.pallas import tpu as pltpu

MSG_LEN = 4
LSTM_OUT = 100            # real hidden size (matches the PyTorch module)
H_PAD = 128               # lane-aligned state width used inside the kernel
GATE_W = 4 * H_PAD        # 512 gate lanes (i, f, g, o -- one 128-lane tile each)
X_OFF = LSTM_OUT + MSG_LEN + 1   # lane 105: first x lane inside the state vector
BIAS_LANE = H_PAD - 1            # lane 127 holds a constant 1.0 (bias row)
MAX_BASE_INP = BIAS_LANE - X_OFF # 22 x-features fit in the dead lanes
NUM_LOOP = 2
NUM_PASS = NUM_LOOP + 1   # first pass + num_loop looped passes
CHUNK_B = 8               # batch rows per grid step (one f32 sublane tile/stream)


def _fused_forward_kernel(x_ref, w_ref, out_ref, h_scratch):
    """Full ModelSimple forward for one batch chunk: 3 passes, 2 streams.

    x_ref     : (2*CB, 128) f32  [x1-chunk ; x2-chunk]: x in lanes 105..,
                1.0 in lane 127, zeros elsewhere. Constant across passes.
    w_ref     : (128, 640) bf16  cols 0..511 = gate weights (W_hh^T rows 0..99,
                msg part of W_ih^T rows 100..103, x part rows 105.., bias row
                127); cols 512..639 = Linear(100->5)+bias packed into output
                lanes 100..104.
    out_ref   : (2*CB, 128) f32  final-pass head output (tanh); lanes 100..104.
    h_scratch : (2*CB, 128) f32  VMEM scratch for the fresh h of both streams.
    """
    two_cb = x_ref.shape[0]
    cb = two_cb // 2
    hp = H_PAD

    x_aug = x_ref[...]                                   # (2*CB, 128) f32

    # Mask selecting the 4 msg lanes (100..103) of the head output.
    lane = jax.lax.broadcasted_iota(jnp.int32, (two_cb, hp), 1)
    msg_mask = ((lane >= LSTM_OUT) & (lane < LSTM_OUT + MSG_LEN)).astype(
        jnp.float32)

    # Recurrent state z: lanes 0..99 = h, 100..103 = msg, 105.. = x, 127 = 1.0.
    z = x_aug                                            # pass 0: h = msg = 0
    c1 = jnp.zeros((cb, hp), jnp.float32)                # carried c state
    out_aug = jnp.zeros((two_cb, hp), jnp.float32)

    for p in range(NUM_PASS):                            # 3 passes, unrolled
        # Both streams' gates in one MXU pass: (2*CB,128)bf16 @ (128,512)bf16.
        gates = jnp.dot(z.astype(jnp.bfloat16), w_ref[:, :GATE_W],
                        preferred_element_type=jnp.float32)
        # PyTorch gate order i, f, g, o -- each slice is a whole 128-lane tile.
        i_g = jax.nn.sigmoid(gates[:, 0 * hp:1 * hp])
        f_g = jax.nn.sigmoid(gates[:, 1 * hp:2 * hp])
        g_g = jnp.tanh(gates[:, 2 * hp:3 * hp])
        o_g = jax.nn.sigmoid(gates[:, 3 * hp:4 * hp])
        ig = i_g * g_g

        # stream 1 cell update, then stream 2 seeded with stream 1's fresh c
        # (exactly as the torch module wires self.c1).
        c1_new = f_g[:cb] * c1 + ig[:cb]
        c2_new = f_g[cb:] * c1_new + ig[cb:]
        # Write fresh h halves straight into VMEM scratch (no concatenate).
        h_scratch[:cb, :] = o_g[:cb] * jnp.tanh(c1_new)
        h_scratch[cb:, :] = o_g[cb:] * jnp.tanh(c2_new)

        # Re-inject the constant x lanes + bias lane (h padding lanes are 0).
        h_aug = h_scratch[...] + x_aug
        # Linear(100->5) + Tanh; outputs land in lanes 100..104, rest stays 0.
        out_aug = jnp.tanh(
            jnp.dot(h_aug.astype(jnp.bfloat16), w_ref[:, GATE_W:],
                    preferred_element_type=jnp.float32))
        # Next-pass state: msg lanes only (prob lane 104 masked out).
        z = h_aug + out_aug * msg_mask
        # c carry, exactly as the reference module:
        #   pass 0 : stream 2's c goes to the never-reused self.c2 -> keep c1
        #   pass >0: stream 2's c overwrites self.c1
        c1 = c1_new if p == 0 else c2_new

    out_ref[...] = out_aug


def _fused_forward(x_aug, w_packed):
    rows = 2 * CHUNK_B
    n_chunks = x_aug.shape[0] // rows
    return pl.pallas_call(
        _fused_forward_kernel,
        out_shape=jax.ShapeDtypeStruct(x_aug.shape, jnp.float32),
        grid_spec=pltpu.PrefetchScalarGridSpec(
            num_scalar_prefetch=0,
            grid=(n_chunks,),
            in_specs=[
                pl.BlockSpec((rows, H_PAD), lambda i: (i, 0)),
                # constant block index -> weights DMA'd once, stay VMEM-resident
                pl.BlockSpec((H_PAD, GATE_W + H_PAD), lambda i: (0, 0)),
            ],
            out_specs=pl.BlockSpec((rows, H_PAD), lambda i: (i, 0)),
            scratch_shapes=[pltpu.VMEM((rows, H_PAD), jnp.float32)],
        ),
        compiler_params=pltpu.CompilerParams(
            dimension_semantics=("parallel",)),
    )(x_aug, w_packed)


def init_raw_params(key, base_inp):
    """Raw parameters in the exact PyTorch shapes."""
    in_sz = base_inp + MSG_LEN
    H = LSTM_OUT
    ks = jax.random.split(key, 6)
    s = 1.0 / jnp.sqrt(H)
    return {
        "w_ih": jax.random.uniform(ks[0], (4 * H, in_sz), jnp.float32, -s, s),
        "w_hh": jax.random.uniform(ks[1], (4 * H, H), jnp.float32, -s, s),
        "b_ih": jax.random.uniform(ks[2], (4 * H,), jnp.float32, -s, s),
        "b_hh": jax.random.uniform(ks[3], (4 * H,), jnp.float32, -s, s),
        "w_lin": jax.random.uniform(ks[4], (MSG_LEN + 1, H), jnp.float32, -s, s),
        "b_lin": jax.random.uniform(ks[5], (MSG_LEN + 1,), jnp.float32, -s, s),
    }


def pack_params(raw, base_inp):
    """Pack the PyTorch-shaped params into ONE bf16 (128, 640) weight buffer."""
    assert base_inp <= MAX_BASE_INP, (
        "this packing folds x into the state vector's dead lanes; "
        f"base_inp must be <= {MAX_BASE_INP}")
    H, Hp, M = LSTM_OUT, H_PAD, MSG_LEN

    w_ih = raw["w_ih"]                     # (4H, base_inp + M)
    w_hh = raw["w_hh"]                     # (4H, H)
    bias = raw["b_ih"] + raw["b_hh"]       # (4H,)
    w_lin = raw["w_lin"]                   # (5, H)
    b_lin = raw["b_lin"]                   # (5,)

    w = jnp.zeros((Hp, GATE_W + Hp), jnp.float32)
    for g in range(4):                     # gates i, f, g, o at 128-lane offsets
        blk_ih = w_ih[g * H:(g + 1) * H]   # (H, base_inp + M)
        blk_hh = w_hh[g * H:(g + 1) * H]   # (H, H)
        c0 = g * Hp
        w = w.at[:H, c0:c0 + H].set(blk_hh.T)                         # h rows
        w = w.at[H:H + M, c0:c0 + H].set(blk_ih[:, base_inp:].T)      # msg rows
        w = w.at[X_OFF:X_OFF + base_inp, c0:c0 + H].set(blk_ih[:, :base_inp].T)
        w = w.at[BIAS_LANE, c0:c0 + H].set(bias[g * H:(g + 1) * H])   # bias row
    # Linear head: 5 outputs land in lanes 100..104 of the head block.
    w = w.at[:H, GATE_W + H:GATE_W + H + M + 1].set(w_lin.T)
    w = w.at[BIAS_LANE, GATE_W + H:GATE_W + H + M + 1].set(b_lin)

    return w.astype(jnp.bfloat16)          # bf16 halves the weight DMA bytes


@functools.partial(jax.jit, static_argnames=("base_inp",))
def model_simple_forward(batch, w_packed, *, base_inp):
    """Faithful ModelSimple.forward. Returns (p1, p2) Bernoulli probabilities."""
    B = batch.shape[0]
    n_chunks = -(-B // CHUNK_B)
    Bp = n_chunks * CHUNK_B

    x1 = jnp.zeros((Bp, base_inp), jnp.float32).at[:B].set(batch[:, :base_inp])
    x2 = jnp.zeros((Bp, base_inp), jnp.float32).at[:B].set(batch[:, base_inp:])
    # Chunk-major layout: [chunk0-stream1 ; chunk0-stream2 ; chunk1-stream1 ; ...]
    x_pair = jnp.concatenate(
        [x1.reshape(n_chunks, 1, CHUNK_B, base_inp),
         x2.reshape(n_chunks, 1, CHUNK_B, base_inp)], axis=1)
    x_pair = x_pair.reshape(n_chunks * 2 * CHUNK_B, base_inp)

    x_aug = jnp.zeros((n_chunks * 2 * CHUNK_B, H_PAD), jnp.float32)
    x_aug = x_aug.at[:, X_OFF:X_OFF + base_inp].set(x_pair)
    x_aug = x_aug.at[:, BIAS_LANE].set(1.0)

    out = _fused_forward(x_aug, w_packed)            # (n_chunks*2*CB, 128)
    out = out.reshape(n_chunks, 2, CHUNK_B, H_PAD)
    p_lane = LSTM_OUT + MSG_LEN                      # lane 104 = out[..., -1]
    # TODO(synk): torch.distributions.Bernoulli has no Pallas equivalent; we
    # return the Bernoulli probabilities instead of distribution objects.
    o1 = out[:, 0].reshape(Bp, H_PAD)[:B, p_lane]
    o2 = out[:, 1].reshape(Bp, H_PAD)[:B, p_lane]
    return (o1 + 1.0) * 0.5, (o2 + 1.0) * 0.5


def _reference_forward(batch, raw, base_inp):
    """Plain-JAX f32 reference of the (faithful) torch state carry."""
    B = batch.shape[0]
    H = LSTM_OUT
    w_ih, w_hh = raw["w_ih"], raw["w_hh"]
    b = raw["b_ih"] + raw["b_hh"]
    w_lin, b_lin = raw["w_lin"], raw["b_lin"]

    def cell(x, h, c):
        gates = x @ w_ih.T + h @ w_hh.T + b
        i = jax.nn.sigmoid(gates[:, 0 * H:1 * H])
        f = jax.nn.sigmoid(gates[:, 1 * H:2 * H])
        g = jnp.tanh(gates[:, 2 * H:3 * H])
        o = jax.nn.sigmoid(gates[:, 3 * H:4 * H])
        c_new = f * c + i * g
        return o * jnp.tanh(c_new), c_new

    def head(h):
        return jnp.tanh(h @ w_lin.T + b_lin)

    x1, x2 = batch[:, :base_inp], batch[:, base_inp:]
    h1 = jnp.zeros((B, H)); c1 = jnp.zeros((B, H)); h2 = jnp.zeros((B, H))
    msg1 = jnp.zeros((B, MSG_LEN)); msg2 = jnp.zeros((B, MSG_LEN))

    h1, c1 = cell(jnp.concatenate([x1, msg1], -1), h1, c1); out1 = head(h1)
    h2, _c2 = cell(jnp.concatenate([x2, msg2], -1), h2, c1); out2 = head(h2)
    for _ in range(NUM_LOOP):
        msg1, msg2 = out1[:, :MSG_LEN], out2[:, :MSG_LEN]
        h1, c1 = cell(jnp.concatenate([x1, msg1], -1), h1, c1); out1 = head(h1)
        h2, c1 = cell(jnp.concatenate([x2, msg2], -1), h2, c1); out2 = head(h2)
    return (out1[:, -1] + 1.0) * 0.5, (out2[:, -1] + 1.0) * 0.5


if __name__ == "__main__":
    key = jax.random.PRNGKey(0)
    k_param, k_data = jax.random.split(key)

    len_data = 16            # base_inp
    B = 4                    # batch size
    batch = jax.random.normal(k_data, (B, 2 * len_data), jnp.float32)

    raw = init_raw_params(k_param, len_data)
    w_packed = pack_params(raw, len_data)

    p1, p2 = model_simple_forward(batch, w_packed, base_inp=len_data)
    jax.block_until_ready((p1, p2))

    r1, r2 = _reference_forward(batch, raw, len_data)
    assert p1.shape == (B,) and p2.shape == (B,)
    # bf16 matmul operands (f32 accumulate / f32 elementwise) vs f32 reference.
    assert bool(jnp.allclose(p1, r1, atol=2e-2))
    assert bool(jnp.allclose(p2, r2, atol=2e-2))
    assert bool(jnp.all((p1 >= 0.0) & (p1 <= 1.0)))
    assert bool(jnp.all((p2 >= 0.0) & (p2 <= 1.0)))
    print("KERNEL_OK")
</pallas_src>

<mosaic_0001>
module attributes {stable_mosaic.version = 11 : i64} {
  func.func @_fused_forward_kernel(%arg0: i32, %arg1: memref<16x128xf32, #tpu.memory_space<vmem>>, %arg2: memref<128x640xbf16, #tpu.memory_space<vmem>>, %arg3: memref<16x128xf32, #tpu.memory_space<vmem>>, %arg4: memref<16x128xf32, #tpu.memory_space<vmem>>) attributes {dimension_semantics = [#tpu.dimension_semantics<parallel>], iteration_bounds = array<i64: 1>, scalar_prefetch = 0 : i64, scratch_operands = 1 : i64, tpu.core_type = #tpu.core_type<tc>, window_params = [{transform_indices = @transform_0, window_bounds = array<i64: 16, 128>}, {pipeline_mode = #tpu.pipeline_mode<synchronous>, transform_indices = @transform_1, window_bounds = array<i64: 128, 640>}, {transform_indices = @transform_2, window_bounds = array<i64: 16, 128>}]} {
    %c0 = arith.constant 0 : index
    %c0_0 = arith.constant 0 : index
    %0 = vector.load %arg1[%c0, %c0_0] : memref<16x128xf32, #tpu.memory_space<vmem>>, vector<16x128xf32>
    %1 = tpu.iota {dimensions = array<i32: 1>} : vector<16x128xi32>
    %c100_i32 = arith.constant 100 : i32
    %2 = vector.broadcast %c100_i32 : i32 to vector<16x128xi32>
    %3 = arith.cmpi sge, %1, %2 : vector<16x128xi32>
    %c104_i32 = arith.constant 104 : i32
    %4 = vector.broadcast %c104_i32 : i32 to vector<16x128xi32>
    %5 = arith.cmpi slt, %1, %4 : vector<16x128xi32>
    %6 = arith.andi %3, %5 : vector<16x128xi1>
    %7 = arith.extui %6 : vector<16x128xi1> to vector<16x128xi32>
    %8 = arith.sitofp %7 : vector<16x128xi32> to vector<16x128xf32>
    %cst = arith.constant 0.000000e+00 : f32
    %9 = vector.broadcast %cst : f32 to vector<8x128xf32>
    %10 = arith.truncf %0 : vector<16x128xf32> to vector<16x128xbf16>
    %c0_1 = arith.constant 0 : index
    %c0_2 = arith.constant 0 : index
    %11 = vector.load %arg2[%c0_1, %c0_2] : memref<128x640xbf16, #tpu.memory_space<vmem>>, vector<128x512xbf16>
    %cst_3 = arith.constant dense<0.000000e+00> : vector<16x512xf32>
    %12 = tpu.matmul %10, %11, %cst_3 {dimension_numbers = #tpu.dot_dimension_numbers<[1], [0], [0], [1], [0, 0, 1, 1], [], []>} : vector<16x128xbf16>, vector<128x512xbf16>, vector<16x512xf32> -> vector<16x512xf32>
    %13 = vector.extract_strided_slice %12 {offsets = [0, 0], sizes = [16, 128], strides = [1, 1]} : vector<16x512xf32> to vector<16x128xf32>
    %14 = arith.negf %13 : vector<16x128xf32>
    %15 = math.exp %14 : vector<16x128xf32>
    %cst_4 = arith.constant 1.000000e+00 : f32
    %16 = vector.broadcast %cst_4 : f32 to vector<16x128xf32>
    %17 = arith.addf %16, %15 : vector<16x128xf32>
    %18 = arith.divf %16, %17 : vector<16x128xf32>
    %19 = vector.extract_strided_slice %12 {offsets = [0, 128], sizes = [16, 128], strides = [1, 1]} : vector<16x512xf32> to vector<16x128xf32>
    %20 = arith.negf %19 : vector<16x128xf32>
    %21 = math.exp %20 : vector<16x128xf32>
    %cst_5 = arith.constant 1.000000e+00 : f32
    %22 = vector.broadcast %cst_5 : f32 to vector<16x128xf32>
    %23 = arith.addf %22, %21 : vector<16x128xf32>
    %24 = arith.divf %22, %23 : vector<16x128xf32>
    %25 = vector.extract_strided_slice %12 {offsets = [0, 256], sizes = [16, 128], strides = [1, 1]} : vector<16x512xf32> to vector<16x128xf32>
    %26 = math.tanh %25 : vector<16x128xf32>
    %27 = vector.extract_strided_slice %12 {offsets = [0, 384], sizes = [16, 128], strides = [1, 1]} : vector<16x512xf32> to vector<16x128xf32>
    %28 = arith.negf %27 : vector<16x128xf32>
    %29 = math.exp %28 : vector<16x128xf32>
    %cst_6 = arith.constant 1.000000e+00 : f32
    %30 = vector.broadcast %cst_6 : f32 to vector<16x128xf32>
    %31 = arith.addf %30, %29 : vector<16x128xf32>
    %32 = arith.divf %30, %31 : vector<16x128xf32>
    %33 = arith.mulf %18, %26 : vector<16x128xf32>
    %34 = vector.extract_strided_slice %24 {offsets = [0, 0], sizes = [8, 128], strides = [1, 1]} : vector<16x128xf32> to vector<8x128xf32>
    %35 = arith.mulf %34, %9 : vector<8x128xf32>
    %36 = vector.extract_strided_slice %33 {offsets = [0, 0], sizes = [8, 128], strides = [1, 1]} : vector<16x128xf32> to vector<8x128xf32>
    %37 = arith.addf %35, %36 : vector<8x128xf32>
    %38 = vector.extract_strided_slice %24 {offsets = [8, 0], sizes = [8, 128], strides = [1, 1]} : vector<16x128xf32> to vector<8x128xf32>
    %39 = arith.mulf %38, %37 : vector<8x128xf32>
    %40 = vector.extract_strided_slice %33 {offsets = [8, 0], sizes = [8, 128], strides = [1, 1]} : vector<16x128xf32> to vector<8x128xf32>
    %41 = arith.addf %39, %40 : vector<8x128xf32>
    %42 = vector.extract_strided_slice %32 {offsets = [0, 0], sizes = [8, 128], strides = [1, 1]} : vector<16x128xf32> to vector<8x128xf32>
    %43 = math.tanh %37 : vector<8x128xf32>
    %44 = arith.mulf %42, %43 : vector<8x128xf32>
    %c0_7 = arith.constant 0 : index
    %c0_8 = arith.constant 0 : index
    %45 = vector.load %arg4[%c0_7, %c0_8] : memref<16x128xf32, #tpu.memory_space<vmem>>, vector<8x128xf32>
    tpu.vector_store %arg4[%c0_7, %c0_8], %44 {strides = array<i32>} : memref<16x128xf32, #tpu.memory_space<vmem>>, vector<8x128xf32>,
    %46 = vector.extract_strided_slice %32 {offsets = [8, 0], sizes = [8, 128], strides = [1, 1]} : vector<16x128xf32> to vector<8x128xf32>
    %47 = math.tanh %41 : vector<8x128xf32>
    %48 = arith.mulf %46, %47 : vector<8x128xf32>
    %c8 = arith.constant 8 : index
    %c0_9 = arith.constant 0 : index
    %49 = vector.load %arg4[%c8, %c0_9] : memref<16x128xf32, #tpu.memory_space<vmem>>, vector<8x128xf32>
    tpu.vector_store %arg4[%c8, %c0_9], %48 {strides = array<i32>} : memref<16x128xf32, #tpu.memory_space<vmem>>, vector<8x128xf32>,
    %c0_10 = arith.constant 0 : index
    %c0_11 = arith.constant 0 : index
    %50 = vector.load %arg4[%c0_10, %c0_11] : memref<16x128xf32, #tpu.memory_space<vmem>>, vector<16x128xf32>
    %51 = arith.addf %50, %0 : vector<16x128xf32>
    %52 = arith.truncf %51 : vector<16x128xf32> to vector<16x128xbf16>
    %c0_12 = arith.constant 0 : index
    %c512 = arith.constant 512 : index
    %53 = vector.load %arg2[%c0_12, %c512] : memref<128x640xbf16, #tpu.memory_space<vmem>>, vector<128x128xbf16>
    %cst_13 = arith.constant dense<0.000000e+00> : vector<16x128xf32>
    %54 = tpu.matmul %52, %53, %cst_13 {dimension_numbers = #tpu.dot_dimension_numbers<[1], [0], [0], [1], [0, 0, 1, 1], [], []>} : vector<16x128xbf16>, vector<128x128xbf16>, vector<16x128xf32> -> vector<16x128xf32>
    %55 = math.tanh %54 : vector<16x128xf32>
    %56 = arith.mulf %55, %8 : vector<16x128xf32>
    %57 = arith.addf %51, %56 : vector<16x128xf32>
    %58 = arith.truncf %57 : vector<16x128xf32> to vector<16x128xbf16>
    %c0_14 = arith.constant 0 : index
    %c0_15 = arith.constant 0 : index
    %59 = vector.load %arg2[%c0_14, %c0_15] : memref<128x640xbf16, #tpu.memory_space<vmem>>, vector<128x512xbf16>
    %cst_16 = arith.constant dense<0.000000e+00> : vector<16x512xf32>
    %60 = tpu.matmul %58, %59, %cst_16 {dimension_numbers = #tpu.dot_dimension_numbers<[1], [0], [0], [1], [0, 0, 1, 1], [], []>} : vector<16x128xbf16>, vector<128x512xbf16>, vector<16x512xf32> -> vector<16x512xf32>
    %61 = vector.extract_strided_slice %60 {offsets = [0, 0], sizes = [16, 128], strides = [1, 1]} : vector<16x512xf32> to vector<16x128xf32>
    %62 = arith.negf %61 : vector<16x128xf32>
    %63 = math.exp %62 : vector<16x128xf32>
    %cst_17 = arith.constant 1.000000e+00 : f32
    %64 = vector.broadcast %cst_17 : f32 to vector<16x128xf32>
    %65 = arith.addf %64, %63 : vector<16x128xf32>
    %66 = arith.divf %64, %65 : vector<16x128xf32>
    %67 = vector.extract_strided_slice %60 {offsets = [0, 128], sizes = [16, 128], strides = [1, 1]} : vector<16x512xf32> to vector<16x128xf32>
    %68 = arith.negf %67 : vector<16x128xf32>
    %69 = math.exp %68 : vector<16x128xf32>
    %cst_18 = arith.constant 1.000000e+00 : f32
    %70 = vector.broadcast %cst_18 : f32 to vector<16x128xf32>
    %71 = arith.addf %70, %69 : vector<16x128xf32>
    %72 = arith.divf %70, %71 : vector<16x128xf32>
    %73 = vector.extract_strided_slice %60 {offsets = [0, 256], sizes = [16, 128], strides = [1, 1]} : vector<16x512xf32> to vector<16x128xf32>
    %74 = math.tanh %73 : vector<16x128xf32>
    %75 = vector.extract_strided_slice %60 {offsets = [0, 384], sizes = [16, 128], strides = [1, 1]} : vector<16x512xf32> to vector<16x128xf32>
    %76 = arith.negf %75 : vector<16x128xf32>
    %77 = math.exp %76 : vector<16x128xf32>
    %cst_19 = arith.constant 1.000000e+00 : f32
    %78 = vector.broadcast %cst_19 : f32 to vector<16x128xf32>
    %79 = arith.addf %78, %77 : vector<16x128xf32>
    %80 = arith.divf %78, %79 : vector<16x128xf32>
    %81 = arith.mulf %66, %74 : vector<16x128xf32>
    %82 = vector.extract_strided_slice %72 {offsets = [0, 0], sizes = [8, 128], strides = [1, 1]} : vector<16x128xf32> to vector<8x128xf32>
    %83 = arith.mulf %82, %37 : vector<8x128xf32>
    %84 = vector.extract_strided_slice %81 {offsets = [0, 0], sizes = [8, 128], strides = [1, 1]} : vector<16x128xf32> to vector<8x128xf32>
    %85 = arith.addf %83, %84 : vector<8x128xf32>
    %86 = vector.extract_strided_slice %72 {offsets = [8, 0], sizes = [8, 128], strides = [1, 1]} : vector<16x128xf32> to vector<8x128xf32>
    %87 = arith.mulf %86, %85 : vector<8x128xf32>
    %88 = vector.extract_strided_slice %81 {offsets = [8, 0], sizes = [8, 128], strides = [1, 1]} : vector<16x128xf32> to vector<8x128xf32>
    %89 = arith.addf %87, %88 : vector<8x128xf32>
    %90 = vector.extract_strided_slice %80 {offsets = [0, 0], sizes = [8, 128], strides = [1, 1]} : vector<16x128xf32> to vector<8x128xf32>
    %91 = math.tanh %85 : vector<8x128xf32>
    %92 = arith.mulf %90, %91 : vector<8x128xf32>
    %c0_20 = arith.constant 0 : index
    %c0_21 = arith.constant 0 : index
    %93 = vector.load %arg4[%c0_20, %c0_21] : memref<16x128xf32, #tpu.memory_space<vmem>>, vector<8x128xf32>
    tpu.vector_store %arg4[%c0_20, %c0_21], %92 {strides = array<i32>} : memref<16x128xf32, #tpu.memory_space<vmem>>, vector<8x128xf32>,
    %94 = vector.extract_strided_slice %80 {offsets = [8, 0], sizes = [8, 128], strides = [1, 1]} : vector<16x128xf32> to vector<8x128xf32>
    %95 = math.tanh %89 : vector<8x128xf32>
    %96 = arith.mulf %94, %95 : vector<8x128xf32>
    %c8_22 = arith.constant 8 : index
    %c0_23 = arith.constant 0 : index
    %97 = vector.load %arg4[%c8_22, %c0_23] : memref<16x128xf32, #tpu.memory_space<vmem>>, vector<8x128xf32>
    tpu.vector_store %arg4[%c8_22, %c0_23], %96 {strides = array<i32>} : memref<16x128xf32, #tpu.memory_space<vmem>>, vector<8x128xf32>,
    %c0_24 = arith.constant 0 : index
    %c0_25 = arith.constant 0 : index
    %98 = vector.load %arg4[%c0_24, %c0_25] : memref<16x128xf32, #tpu.memory_space<vmem>>, vector<16x128xf32>
    %99 = arith.addf %98, %0 : vector<16x128xf32>
    %100 = arith.truncf %99 : vector<16x128xf32> to vector<16x128xbf16>
    %c0_26 = arith.constant 0 : index
    %c512_27 = arith.constant 512 : index
    %101 = vector.load %arg2[%c0_26, %c512_27] : memref<128x640xbf16, #tpu.memory_space<vmem>>, vector<128x128xbf16>
    %cst_28 = arith.constant dense<0.000000e+00> : vector<16x128xf32>
    %102 = tpu.matmul %100, %101, %cst_28 {dimension_numbers = #tpu.dot_dimension_numbers<[1], [0], [0], [1], [0, 0, 1, 1], [], []>} : vector<16x128xbf16>, vector<128x128xbf16>, vector<16x128xf32> -> vector<16x128xf32>
    %103 = math.tanh %102 : vector<16x128xf32>
    %104 = arith.mulf %103, %8 : vector<16x128xf32>
    %105 = arith.addf %99, %104 : vector<16x128xf32>
    %106 = arith.truncf %105 : vector<16x128xf32> to vector<16x128xbf16>
    %c0_29 = arith.constant 0 : index
    %c0_30 = arith.constant 0 : index
    %107 = vector.load %arg2[%c0_29, %c0_30] : memref<128x640xbf16, #tpu.memory_space<vmem>>, vector<128x512xbf16>
    %cst_31 = arith.constant dense<0.000000e+00> : vector<16x512xf32>
    %108 = tpu.matmul %106, %107, %cst_31 {dimension_numbers = #tpu.dot_dimension_numbers<[1], [0], [0], [1], [0, 0, 1, 1], [], []>} : vector<16x128xbf16>, vector<128x512xbf16>, vector<16x512xf32> -> vector<16x512xf32>
    %109 = vector.extract_strided_slice %108 {offsets = [0, 0], sizes = [16, 128], strides = [1, 1]} : vector<16x512xf32> to vector<16x128xf32>
    %110 = arith.negf %109 : vector<16x128xf32>
    %111 = math.exp %110 : vector<16x128xf32>
    %cst_32 = arith.constant 1.000000e+00 : f32
    %112 = vector.broadcast %cst_32 : f32 to vector<16x128xf32>
    %113 = arith.addf %112, %111 : vector<16x128xf32>
    %114 = arith.divf %112, %113 : vector<16x128xf32>
    %115 = vector.extract_strided_slice %108 {offsets = [0, 128], sizes = [16, 128], strides = [1, 1]} : vector<16x512xf32> to vector<16x128xf32>
    %116 = arith.negf %115 : vector<16x128xf32>
    %117 = math.exp %116 : vector<16x128xf32>
    %cst_33 = arith.constant 1.000000e+00 : f32
    %118 = vector.broadcast %cst_33 : f32 to vector<16x128xf32>
    %119 = arith.addf %118, %117 : vector<16x128xf32>
    %120 = arith.divf %118, %119 : vector<16x128xf32>
    %121 = vector.extract_strided_slice %108 {offsets = [0, 256], sizes = [16, 128], strides = [1, 1]} : vector<16x512xf32> to vector<16x128xf32>
    %122 = math.tanh %121 : vector<16x128xf32>
    %123 = vector.extract_strided_slice %108 {offsets = [0, 384], sizes = [16, 128], strides = [1, 1]} : vector<16x512xf32> to vector<16x128xf32>
    %124 = arith.negf %123 : vector<16x128xf32>
    %125 = math.exp %124 : vector<16x128xf32>
    %cst_34 = arith.constant 1.000000e+00 : f32
    %126 = vector.broadcast %cst_34 : f32 to vector<16x128xf32>
    %127 = arith.addf %126, %125 : vector<16x128xf32>
    %128 = arith.divf %126, %127 : vector<16x128xf32>
    %129 = arith.mulf %114, %122 : vector<16x128xf32>
    %130 = vector.extract_strided_slice %120 {offsets = [0, 0], sizes = [8, 128], strides = [1, 1]} : vector<16x128xf32> to vector<8x128xf32>
    %131 = arith.mulf %130, %89 : vector<8x128xf32>
    %132 = vector.extract_strided_slice %129 {offsets = [0, 0], sizes = [8, 128], strides = [1, 1]} : vector<16x128xf32> to vector<8x128xf32>
    %133 = arith.addf %131, %132 : vector<8x128xf32>
    %134 = vector.extract_strided_slice %120 {offsets = [8, 0], sizes = [8, 128], strides = [1, 1]} : vector<16x128xf32> to vector<8x128xf32>
    %135 = arith.mulf %134, %133 : vector<8x128xf32>
    %136 = vector.extract_strided_slice %129 {offsets = [8, 0], sizes = [8, 128], strides = [1, 1]} : vector<16x128xf32> to vector<8x128xf32>
    %137 = arith.addf %135, %136 : vector<8x128xf32>
    %138 = vector.extract_strided_slice %128 {offsets = [0, 0], sizes = [8, 128], strides = [1, 1]} : vector<16x128xf32> to vector<8x128xf32>
    %139 = math.tanh %133 : vector<8x128xf32>
    %140 = arith.mulf %138, %139 : vector<8x128xf32>
    %c0_35 = arith.constant 0 : index
    %c0_36 = arith.constant 0 : index
    %141 = vector.load %arg4[%c0_35, %c0_36] : memref<16x128xf32, #tpu.memory_space<vmem>>, vector<8x128xf32>
    tpu.vector_store %arg4[%c0_35, %c0_36], %140 {strides = array<i32>} : memref<16x128xf32, #tpu.memory_space<vmem>>, vector<8x128xf32>,
    %142 = vector.extract_strided_slice %128 {offsets = [8, 0], sizes = [8, 128], strides = [1, 1]} : vector<16x128xf32> to vector<8x128xf32>
    %143 = math.tanh %137 : vector<8x128xf32>
    %144 = arith.mulf %142, %143 : vector<8x128xf32>
    %c8_37 = arith.constant 8 : index
    %c0_38 = arith.constant 0 : index
    %145 = vector.load %arg4[%c8_37, %c0_38] : memref<16x128xf32, #tpu.memory_space<vmem>>, vector<8x128xf32>
    tpu.vector_store %arg4[%c8_37, %c0_38], %144 {strides = array<i32>} : memref<16x128xf32, #tpu.memory_space<vmem>>, vector<8x128xf32>,
    %c0_39 = arith.constant 0 : index
    %c0_40 = arith.constant 0 : index
    %146 = vector.load %arg4[%c0_39, %c0_40] : memref<16x128xf32, #tpu.memory_space<vmem>>, vector<16x128xf32>
    %147 = arith.addf %146, %0 : vector<16x128xf32>
    %148 = arith.truncf %147 : vector<16x128xf32> to vector<16x128xbf16>
    %c0_41 = arith.constant 0 : index
    %c512_42 = arith.constant 512 : index
    %149 = vector.load %arg2[%c0_41, %c512_42] : memref<128x640xbf16, #tpu.memory_space<vmem>>, vector<128x128xbf16>
    %cst_43 = arith.constant dense<0.000000e+00> : vector<16x128xf32>
    %150 = tpu.matmul %148, %149, %cst_43 {dimension_numbers = #tpu.dot_dimension_numbers<[1], [0], [0], [1], [0, 0, 1, 1], [], []>} : vector<16x128xbf16>, vector<128x128xbf16>, vector<16x128xf32> -> vector<16x128xf32>
    %151 = math.tanh %150 : vector<16x128xf32>
    %c0_44 = arith.constant 0 : index
    %c0_45 = arith.constant 0 : index
    %152 = vector.load %arg3[%c0_44, %c0_45] : memref<16x128xf32, #tpu.memory_space<vmem>>, vector<16x128xf32>
    tpu.vector_store %arg3[%c0_44, %c0_45], %151 {strides = array<i32>} : memref<16x128xf32, #tpu.memory_space<vmem>>, vector<16x128xf32>,
    return
  }
  func.func @transform_0(%arg0: i32) -> (i32, i32) {
    %c0_i32 = arith.constant 0 : i32
    %c0_i32_0 = arith.constant 0 : i32
    return %arg0, %c0_i32 : i32, i32
  }
  func.func @transform_1(%arg0: i32) -> (i32, i32) {
    %c0_i32 = arith.constant 0 : i32
    %c0_i32_0 = arith.constant 0 : i32
    %c0_i32_1 = arith.constant 0 : i32
    return %c0_i32, %c0_i32_0 : i32, i32
  }
  func.func @transform_2(%arg0: i32) -> (i32, i32) {
    %c0_i32 = arith.constant 0 : i32
    %c0_i32_0 = arith.constant 0 : i32
    return %arg0, %c0_i32 : i32, i32
  }
}

</mosaic_0001>

<bundles_post_ra>
// kernel: model_simple_forward.1
= control target key start
LH: loop header
LB: loop body
LE: loop exit
PB: predicated region body
PF: predicated region fallthrough
CT: control target
= control target key end

     0   :  { %7 = vsyncpa [#allocation4], 0  ;;  %s1809_s9 = smov [#allocation3]   ;;  %s2078_s0 = inlined_call_operand.vmem [shape: f32[16,128], index: 0, kind: input, shape index: {}]   ;;  %s2079_s1 = inlined_call_operand.hbm [shape: bf16[128,640], index: 1, kind: input, shape index: {}]   ;;  %s2080_s2 = inlined_call_operand.vmem [shape: f32[16,128], index: 2, kind: output, shape index: {}]  }
   0x1   :  { %s15_s10 = sshll.u32 %s1809_s9, 4  ;;  %s1785_s13 = scalar_lea.hbm %s2079_s1, 5120  ;;  %s16_s10 = int_to_ptr.vmem [resolvable:$true] %s15_s10 }
   0x2   :  { %p1786_p0 = scmp.ne.s32.totalorder %s2079_s1, %s1785_s13  ;;  %p1789_p1 = scmp.lt.u32.totalorder %s1785_s13, %s2079_s1 }
   0x4   :  { %p1791_p2 = pnand %p1789_p1, %p1786_p0 }
   0x6   :  { %1794 = shalt.err (!%p1791_p2)
}
   0x7   :  { %s1795_s18 = scalar_lea.vmem %s16_s10, 5120  ;;  %p1800_p4 = scmp.lt.s32.totalorder %s16_s10, %s16_s10 }
   0x8   :  { %p1796_p3 = scmp.ne.s32.totalorder %s16_s10, %s1795_s18  ;;  %p1801_p5 = scmp.lt.s32.totalorder %s1795_s18, %s1795_s18 }
   0xa   :  { %p1802_p6 = por %p1801_p5, %p1800_p4 }
   0xc   :  { %p1803_p7 = pnand %p1802_p6, %p1796_p3 }
   0xe   :  { %1806 = shalt.err (!%p1803_p7)
}
   0xf   :  { %s1810_s19 = smov 320   ;;  %s1811_s20 = smov 20  }
  0x10   :  { %21 = dma.hbm_to_vmem [thread:$0]  %s2079_s1, 5120, %s16_s10, [#allocation4], %s1810_s19, %s1810_s19, %s1811_s20  }
  0x11   :  { %1807 = dma.done.wait [#allocation4], 5120  }
  0x12   :  { %1808 = vsyncadd [#allocation4], 4294962176  ;;  %v1812_v0 = vmov 0   ;;  %v1844_v1 = vld [vmem:[#allocation3 + $0x4] ss:$20 sps:$4 sm:$0xff]   ;;  %v1933_v31 = vld [vmem:[%s2078_s0 + $0x8] sm:$0xff] }
  0x13   :  { %260 = vmatprep.mubr.bf16.mxu0 %v1812_v0  ;;  %303 = vmatprep.mubr.bf16.mxu1 %v1812_v0  ;;  %v1846_v2 = vld [vmem:[#allocation3] ss:$20 sps:$4 sm:$0xff]   ;;  %v1852_v4 = vld [vmem:[#allocation3 + $0x28] ss:$20 sps:$4 sm:$0xff]   ;;  %v1862_v8 = vld [vmem:[#allocation3 + $0x50] ss:$20 sps:$4 sm:$0xff]  }
  0x14   :  { %228 = vmatprep.subr.bf16.mxu0 %v1844_v1  ;;  %v1849_v3 = vld [vmem:[#allocation3 + $0x2c] ss:$20 sps:$4 sm:$0xff]   ;;  %v1855_v5 = vld [vmem:[#allocation3 + $0x54] ss:$20 sps:$4 sm:$0xff]   ;;  %v1864_v9 = vld [vmem:[#allocation3 + $0x7c] ss:$20 sps:$4 sm:$0xff]  }
  0x15   :  { %229 = vmatpush1.bf16.msra.mxu0 %v1846_v2  ;;  %v1857_v6 = vld [vmem:[#allocation3 + $0xc] ss:$20 sps:$4 sm:$0xff]   ;;  %v1859_v7 = vld [vmem:[#allocation3 + $0x8] ss:$20 sps:$4 sm:$0xff]   ;;  %v1871_v11 = vld [vmem:[#allocation3 + $0x30] ss:$20 sps:$4 sm:$0xff]  }
  0x16   :  { %230 = vmatprep.subr.bf16.mxu0 %v1849_v3  ;;  %271 = vmatprep.subr.bf16.mxu1 %v1857_v6  ;;  %v1868_v10 = vld [vmem:[#allocation3 + $0x34] ss:$20 sps:$4 sm:$0xff]   ;;  %v1875_v12 = vld [vmem:[#allocation3 + $0x78] ss:$20 sps:$4 sm:$0xff]   ;;  %v1877_v13 = vld [vmem:[#allocation3 + $0x5c] ss:$20 sps:$4 sm:$0xff]  }
  0x17   :  { %272 = vmatpush1.bf16.msra.mxu1 %v1859_v7  ;;  %v1880_v14 = vld [vmem:[#allocation3 + $0xa4] ss:$20 sps:$4 sm:$0xff]   ;;  %v1889_v17 = vld [vmem:[#allocation3 + $0xa0] ss:$20 sps:$4 sm:$0xff]   ;;  %v1901_v21 = vld [vmem:[#allocation3 + $0xc8] ss:$20 sps:$4 sm:$0xff]  }
  0x18   :  { %273 = vmatprep.subr.bf16.mxu1 %v1868_v10  ;;  %v1883_v15 = vld [vmem:[#allocation3 + $0x58] ss:$20 sps:$4 sm:$0xff]   ;;  %v1895_v19 = vld [vmem:[#allocation3 + $0x80] ss:$20 sps:$4 sm:$0xff]   ;;  %v1906_v23 = vld [vmem:[#allocation3 + $0xf0] ss:$20 sps:$4 sm:$0xff]  }
  0x19   :  { %231 = vmatpush1.bf16.msra.mxu0 %v1852_v4  ;;  %v1886_v16 = vld [vmem:[#allocation3 + $0x84] ss:$20 sps:$4 sm:$0xff]   ;;  %v1892_v18 = vld [vmem:[#allocation3 + $0xcc] ss:$20 sps:$4 sm:$0xff]   ;;  %v1904_v22 = vld [vmem:[#allocation3 + $0xf4] ss:$20 sps:$4 sm:$0xff]  }
  0x1a   :  { %232 = vmatprep.subr.bf16.mxu0 %v1855_v5  ;;  %v1898_v20 = vld [vmem:[#allocation3 + $0xac] ss:$20 sps:$4 sm:$0xff]   ;;  %v1909_v24 = vld [vmem:[#allocation3 + $0xa8] ss:$20 sps:$4 sm:$0xff]   ;;  %v1917_v27 = vld [vmem:[#allocation3 + $0xd0] ss:$20 sps:$4 sm:$0xff]  }
  0x1b   :  { %274 = vmatpush1.bf16.msra.mxu1 %v1871_v11  ;;  %v1911_v25 = vld [vmem:[#allocation3 + $0xd4] ss:$20 sps:$4 sm:$0xff]   ;;  %v1913_v26 = vld [vmem:[#allocation3 + $0x11c] ss:$20 sps:$4 sm:$0xff]   ;;  %v1922_v29 = vld [vmem:[#allocation3 + $0x118] ss:$20 sps:$4 sm:$0xff]  }
  0x1c   :  { %275 = vmatprep.subr.bf16.mxu1 %v1877_v13  ;;  %v1920_v28 = vld [vmem:[#allocation3 + $0xfc] ss:$20 sps:$4 sm:$0xff]   ;;  %v1928_v30 = vld [vmem:[%s2078_s0] sm:$0xff]  ;;  %v1937_v32 = vld [vmem:[#allocation3 + $0xf8] ss:$20 sps:$4 sm:$0xff]   ;;  %v1813_v37 = vmov 0.0  }
  0x1d   :  { %233 = vmatpush1.bf16.msra.mxu0 %v1862_v8  ;;  %v1940_v33 = vld [vmem:[#allocation3 + $0x124] ss:$20 sps:$4 sm:$0xff]   ;;  %v35_v34 = vpack.c.bf16 %v1933_v31, %v1928_v30  ;;  %v1947_v35 = vld [vmem:[#allocation3 + $0x120] ss:$20 sps:$4 sm:$0xff]   ;;  %v1656_v40 = vld [vmem:[#allocation3 + $0x88] ss:$20 sps:$4 sm:$0xff]  }
  0x1e   :  { %234 = vmatprep.subr.bf16.mxu0 %v1864_v9  ;;  %v1653_v36 = vld [vmem:[#allocation3 + $0x10] ss:$20 sps:$4 sm:$0xff]   ;;  %v1654_v38 = vld [vmem:[#allocation3 + $0x38] ss:$20 sps:$4 sm:$0xff]   ;;  %v1655_v39 = vld [vmem:[#allocation3 + $0x60] ss:$20 sps:$4 sm:$0xff]  }
  0x1f   :  { %276 = vmatpush1.bf16.msra.mxu1 %v1883_v15  ;;  %v1657_v41 = vld [vmem:[#allocation3 + $0xb0] ss:$20 sps:$4 sm:$0xff]   ;;  %v1658_v42 = vld [vmem:[#allocation3 + $0xd8] ss:$20 sps:$4 sm:$0xff]   ;;  %vm1814_vm0 = vmmov 0  }
  0x20   :  { %277 = vmatprep.subr.bf16.mxu1 %v1886_v16  ;;  %v1659_v43 = vld [vmem:[#allocation3 + $0x100] ss:$20 sps:$4 sm:$0xff]   ;;  %v1660_v44 = vld [vmem:[#allocation3 + $0x128] ss:$20 sps:$4 sm:$0xff]  }
  0x21   :  { %235 = vmatpush1.bf16.msra.mxu0 %v1875_v12 }
  0x22   :  { %236 = vmatprep.subr.bf16.mxu0 %v1880_v14 }
  0x23   :  { %278 = vmatpush1.bf16.msra.mxu1 %v1895_v19 }
  0x24   :  { %279 = vmatprep.subr.bf16.mxu1 %v1898_v20 }
  0x25   :  { %237 = vmatpush1.bf16.msra.mxu0 %v1889_v17 }
  0x26   :  { %238 = vmatprep.subr.bf16.mxu0 %v1892_v18 }
  0x27   :  { %280 = vmatpush1.bf16.msra.mxu1 %v1909_v24 }
  0x28   :  { %281 = vmatprep.subr.bf16.mxu1 %v1911_v25 }
  0x29   :  { %239 = vmatpush1.bf16.msra.mxu0 %v1901_v21 }
  0x2a   :  { %240 = vmatprep.subr.bf16.mxu0 %v1904_v22 }
  0x2b   :  { %282 = vmatpush1.bf16.msra.mxu1 %v1917_v27 }
  0x2c   :  { %283 = vmatprep.subr.bf16.mxu1 %v1920_v28 }
  0x2d   :  { %241 = vmatpush1.bf16.msra.mxu0 %v1906_v23 }
  0x2e   :  { %242 = vmatprep.subr.bf16.mxu0 %v1913_v26 }
  0x2f   :  { %284 = vmatpush1.bf16.msra.mxu1 %v1937_v32 }
  0x30   :  { %285 = vmatprep.subr.bf16.mxu1 %v1940_v33 }
  0x31   :  { %243 = vmatpush1.bf16.msra.mxu0 %v1922_v29 }
  0x32   :  { %1539 = vmatprep.subr.bf16.mxu0 %v1813_v37 }
  0x33   :  { %286 = vmatpush1.bf16.msra.mxu1 %v1947_v35 }
  0x34   :  { %261 = vmatmul.mubr.bf16.vlgmr.msra.gmra.mrb[0].mxu0 %v35_v34  ;;  %673 = vmatprep.subr.bf16.mxu1 %v1844_v1 }
  0x35   :  { %1540 = vmatpush3.bf16.msra.mxu0 %v1653_v36  ;;  %1555 = vmatprep.mubr.msk.bf16.mxu0 %vm1814_vm0, %v1813_v37 }
  0x36   :  { %304 = vmatmul.mubr.bf16.vlgmr.msra.gmra.mrb[0].mxu1 %v35_v34  ;;  %1541 = vmatprep.subr.bf16.mxu0 %v1813_v37 }
  0x37   :  { %674 = vmatpush1.bf16.msra.mxu1 %v1846_v2  ;;  %705 = vmatprep.mubr.bf16.mxu1 %v1812_v0 }
  0x38   :  { %675 = vmatprep.subr.bf16.mxu1 %v1849_v3 }
  0x39   :  { %1542 = vmatpush3.bf16.msra.mxu0 %v1654_v38 }
  0x3a   :  { %1543 = vmatprep.subr.bf16.mxu0 %v1813_v37 }
  0x3b   :  { %676 = vmatpush1.bf16.msra.mxu1 %v1852_v4 }
  0x3c   :  { %677 = vmatprep.subr.bf16.mxu1 %v1855_v5 }
  0x3d   :  { %1544 = vmatpush3.bf16.msra.mxu0 %v1655_v39 }
  0x3e   :  { %1545 = vmatprep.subr.bf16.mxu0 %v1813_v37 }
  0x3f   :  { %678 = vmatpush1.bf16.msra.mxu1 %v1862_v8 }
  0x40   :  { %679 = vmatprep.subr.bf16.mxu1 %v1864_v9 }
  0x41   :  { %1546 = vmatpush3.bf16.msra.mxu0 %v1656_v40 }
  0x42   :  { %1547 = vmatprep.subr.bf16.mxu0 %v1813_v37 }
  0x43   :  { %680 = vmatpush1.bf16.msra.mxu1 %v1875_v12 }
  0x44   :  { %681 = vmatprep.subr.bf16.mxu1 %v1880_v14 }
  0x45   :  { %1548 = vmatpush3.bf16.msra.mxu0 %v1657_v41 }
  0x46   :  { %1549 = vmatprep.subr.bf16.mxu0 %v1813_v37 }
  0x47   :  { %682 = vmatpush1.bf16.msra.mxu1 %v1889_v17 }
  0x48   :  { %683 = vmatprep.subr.bf16.mxu1 %v1892_v18 }
  0x49   :  { %1550 = vmatpush3.bf16.msra.mxu0 %v1658_v42 }
  0x4a   :  { %1551 = vmatprep.subr.bf16.mxu0 %v1813_v37 }
  0x4b   :  { %684 = vmatpush1.bf16.msra.mxu1 %v1901_v21 }
  0x4c   :  { %685 = vmatprep.subr.bf16.mxu1 %v1904_v22 }
  0x4d   :  { %1552 = vmatpush3.bf16.msra.mxu0 %v1659_v43 }
  0x4e   :  { %1553 = vmatprep.subr.bf16.mxu0 %v1813_v37 }
  0x4f   :  { %686 = vmatpush1.bf16.msra.mxu1 %v1906_v23 }
  0x50   :  { %687 = vmatprep.subr.bf16.mxu1 %v1913_v26 }
  0x51   :  { %1554 = vmatpush3.bf16.msra.mxu0 %v1660_v44 }
  0x52   :  { %716 = vmatprep.subr.bf16.mxu0 %v1857_v6 }
  0x53   :  { %688 = vmatpush1.bf16.msra.mxu1 %v1922_v29 }
  0x54   :  { %1559 = vmatprep.subr.bf16.mxu1 %v1813_v37 }
 0x107   :  { %v262_v45 = vpop.f32.mrb[0].mxu0 }
 0x108   :  { %v1406_v46 = vmul.f32 -1.442695, %v262_v45  ;;  %v264_v47 = vpop.f32.mrb[1].mxu0 }
 0x109   :  { %v1408_v48 = vmul.f32 -1.442695, %v264_v47  ;;  %v266_v49 = vpop.f32.mrb[2].mxu0  ;;  %v305_v53 = vpop.f32.mrb[0].mxu1 }
 0x10a   :  { %1677 = vpow2.f32 %v1406_v46  ;;  %v1407_v50 = vmul.f32 -1.442695, %v266_v49  ;;  %v268_v51 = vpop.f32.mrb[3].mxu0  ;;  %v307_v54 = vpop.f32.mrb[1].mxu1 }
 0x10b   :  { %1679 = vpow2.f32 %v1408_v48  ;;  %v1409_v52 = vmul.f32 -1.442695, %v268_v51  ;;  %v309_v55 = vpop.f32.mrb[2].mxu1  ;;  %v1410_v57 = vmul.f32 -1.442695, %v307_v54 }
 0x10c   :  { %1681 = vpow2.f32 %v1407_v50  ;;  %v311_v56 = vpop.f32.mrb[3].mxu1 }
 0x10d   :  { %1683 = vpow2.f32 %v1409_v52  ;;  %v1411_v58 = vmul.f32 -1.442695, %v311_v56 }
 0x10e   :  { %1685 = vtanh.f32 %v305_v53 }
 0x10f   :  { %1687 = vtanh.f32 %v309_v55 }
 0x110   :  { %1689 = vpow2.f32 %v1410_v57 }
 0x111   :  { %1691 = vpow2.f32 %v1411_v58 }
 0x114   :  { %v1678_v59 = vpop.eup %1677 }
 0x115   :  { %v1680_v60 = vpop.eup %1679  ;;  %v320_v61 = vadd.f32 1.0, %v1678_v59 }
 0x116   :  { %v1682_v62 = vpop.eup %1681  ;;  %v332_v63 = vadd.f32 1.0, %v1680_v60 }
 0x117   :  { %v1684_v34 = vpop.eup %1683  ;;  %1693 = vrcp.f32 %v320_v61  ;;  %v321_v36 = vadd.f32 1.0, %v1682_v62 }
 0x118   :  { %1695 = vrcp.f32 %v332_v63  ;;  %v333_v38 = vadd.f32 1.0, %v1684_v34  ;;  %v1686_v39 = vpop.eup %1685  ;;  %v28_v34 = vlaneseq }
 0x119   :  { %1697 = vrcp.f32 %v321_v36  ;;  %v1688_v40 = vpop.eup %1687 }
 0x11a   :  { %1699 = vrcp.f32 %v333_v38  ;;  %v1690_v41 = vpop.eup %1689  ;;  %v29_v36 = vand.u32 127, %v28_v34 }
 0x11b   :  { %v1692_v42 = vpop.eup %1691  ;;  %v346_v46 = vadd.f32 1.0, %v1690_v41 }
 0x11c   :  { %v347_v52 = vadd.f32 1.0, %v1692_v42  ;;  %vm30_vm1 = vcmp.ge.s32.totalorder %v29_v36, 100  ;;  %vm31_vm2 = vcmp.lt.s32.totalorder %v29_v36, 104 }
 0x11d   :  { %1701 = vrcp.f32 %v346_v46  ;;  %vm32_vm3 = vmand %vm30_vm1, %vm31_vm2 }
 0x11e   :  { %v2005_v42 = vsel %vm32_vm3, 1.0, %v1813_v37 }
 0x121   :  { %v1694_v43 = vpop.eup %1693 }
 0x122   :  { %v1696_v44 = vpop.eup %1695  ;;  %v352_v45 = vmul.f32 %v1694_v43, %v1686_v39 }
 0x123   :  { %v1698_v47 = vpop.eup %1697  ;;  %v354_v48 = vmul.f32 0.0, %v1696_v44 }
 0x124   :  { %v353_v49 = vmul.f32 %v1698_v47, %v1688_v40  ;;  %v1700_v51 = vpop.eup %1699 }
 0x125   :  { %v1981_v50 = vadd.f32 %v354_v48, %v352_v45 }
 0x127   :  { %1703 = vtanh.f32 %v1981_v50  ;;  %v356_v53 = vmul.f32 %v1700_v51, %v1981_v50  ;;  %v1702_v55 = vpop.eup %1701 }
 0x128   :  { %1705 = vrcp.f32 %v347_v52 }
 0x129   :  { %v357_v54 = vadd.f32 %v356_v53, %v353_v49 }
 0x12b   :  { %1707 = vtanh.f32 %v357_v54 }
 0x131   :  { %v1704_v56 = vpop.eup %1703 }
 0x132   :  { %v1706_v57 = vpop.eup %1705  ;;  %v359_v58 = vmul.f32 %v1704_v56, %v1702_v55 }
 0x134   :  { %v366_v61 = vadd.f32 %v359_v58, %v1928_v30 }
 0x135   :  { %v1708_v59 = vpop.eup %1707 }
 0x136   :  { %v362_v60 = vmul.f32 %v1708_v59, %v1706_v57 }
 0x138   :  { %v367_v62 = vadd.f32 %v362_v60, %v1933_v31 }
 0x13a   :  { %v368_v63 = vpack.c.bf16 %v367_v62, %v366_v61 }
 0x13c   :  { %1556 = vmatmul.mubr.bf16.vlgmr.msra.gmra.mrb[4].mxu0 %v368_v63 }
 0x13d   :  { %717 = vmatpush1.bf16.msra.mxu0 %v1859_v7  ;;  %748 = vmatprep.mubr.bf16.mxu0 %v1812_v0 }
 0x13e   :  { %718 = vmatprep.subr.bf16.mxu0 %v1868_v10 }
 0x141   :  { %719 = vmatpush1.bf16.msra.mxu0 %v1871_v11 }
 0x142   :  { %720 = vmatprep.subr.bf16.mxu0 %v1877_v13 }
 0x145   :  { %721 = vmatpush1.bf16.msra.mxu0 %v1883_v15 }
 0x146   :  { %722 = vmatprep.subr.bf16.mxu0 %v1886_v16 }
 0x149   :  { %723 = vmatpush1.bf16.msra.mxu0 %v1895_v19 }
 0x14a   :  { %724 = vmatprep.subr.bf16.mxu0 %v1898_v20 }
 0x14d   :  { %725 = vmatpush1.bf16.msra.mxu0 %v1909_v24 }
 0x14e   :  { %726 = vmatprep.subr.bf16.mxu0 %v1911_v25 }
 0x151   :  { %727 = vmatpush1.bf16.msra.mxu0 %v1917_v27 }
 0x152   :  { %728 = vmatprep.subr.bf16.mxu0 %v1920_v28 }
 0x155   :  { %729 = vmatpush1.bf16.msra.mxu0 %v1937_v32 }
 0x156   :  { %730 = vmatprep.subr.bf16.mxu0 %v1940_v33 }
 0x159   :  { %731 = vmatpush1.bf16.msra.mxu0 %v1947_v35 }
 0x15a   :  { %1118 = vmatprep.subr.bf16.mxu0 %v1844_v1 }
 0x20f   :  { %v467_v38 = vpop.f32.mrb[4].mxu0 }
 0x210   :  { %1709 = vtanh.f32 %v467_v38  ;;  %v1557_v39 = vpop.f32.mrb[5].mxu0 }
 0x211   :  { %v470_v40 = vpop.f32.mrb[6].mxu0 }
 0x212   :  { %1711 = vtanh.f32 %v470_v40  ;;  %v1558_v41 = vpop.f32.mrb[7].mxu0 }
 0x21a   :  { %v1710_v43 = vpop.eup %1709 }
 0x21b   :  { %v476_v44 = vmul.f32 %v1710_v43, %v2005_v42 }
 0x21c   :  { %v1712_v45 = vpop.eup %1711 }
 0x21d   :  { %v477_v1 = vmul.f32 %v1712_v45, %v2005_v42  ;;  %v478_v46 = vadd.f32 %v476_v44, %v366_v61 }
 0x21f   :  { %v479_v47 = vadd.f32 %v477_v1, %v367_v62 }
 0x221   :  { %v480_v48 = vpack.c.bf16 %v479_v47, %v478_v46 }
 0x223   :  { %706 = vmatmul.mubr.bf16.vlgmr.msra.gmra.mrb[4].mxu1 %v480_v48  ;;  %749 = vmatmul.mubr.bf16.vlgmr.msra.gmra.mrb[8].mxu0 %v480_v48 }
 0x224   :  { %1575 = vmatprep.mubr.msk.bf16.mxu1 %vm1814_vm0, %v1813_v37  ;;  %1119 = vmatpush1.bf16.msra.mxu0 %v1846_v2  ;;  %v1661_v2 = vld [vmem:[#allocation3 + $0x10] ss:$20 sps:$4 sm:$0xff]  }
 0x225   :  { %1120 = vmatprep.subr.bf16.mxu0 %v1849_v3  ;;  %1150 = vmatprep.mubr.bf16.mxu0 %v1812_v0  ;;  %v1662_v3 = vld [vmem:[#allocation3 + $0x38] ss:$20 sps:$4 sm:$0xff]  }
 0x226   :  { %1560 = vmatpush3.bf16.msra.mxu1 %v1661_v2 }
 0x227   :  { %1561 = vmatprep.subr.bf16.mxu1 %v1813_v37 }
 0x228   :  { %1121 = vmatpush1.bf16.msra.mxu0 %v1852_v4  ;;  %v1663_v4 = vld [vmem:[#allocation3 + $0x60] ss:$20 sps:$4 sm:$0xff]  }
 0x229   :  { %1122 = vmatprep.subr.bf16.mxu0 %v1855_v5  ;;  %v1664_v5 = vld [vmem:[#allocation3 + $0x88] ss:$20 sps:$4 sm:$0xff]  }
 0x22a   :  { %1562 = vmatpush3.bf16.msra.mxu1 %v1662_v3 }
 0x22b   :  { %1563 = vmatprep.subr.bf16.mxu1 %v1813_v37 }
 0x22c   :  { %1123 = vmatpush1.bf16.msra.mxu0 %v1862_v8  ;;  %v1665_v8 = vld [vmem:[#allocation3 + $0xb0] ss:$20 sps:$4 sm:$0xff]  }
 0x22d   :  { %1124 = vmatprep.subr.bf16.mxu0 %v1864_v9  ;;  %v1666_v9 = vld [vmem:[#allocation3 + $0xd8] ss:$20 sps:$4 sm:$0xff]  }
 0x22e   :  { %1564 = vmatpush3.bf16.msra.mxu1 %v1663_v4 }
 0x22f   :  { %1565 = vmatprep.subr.bf16.mxu1 %v1813_v37 }
 0x230   :  { %1125 = vmatpush1.bf16.msra.mxu0 %v1875_v12  ;;  %v1667_v12 = vld [vmem:[#allocation3 + $0x100] ss:$20 sps:$4 sm:$0xff]  }
 0x231   :  { %1126 = vmatprep.subr.bf16.mxu0 %v1880_v14  ;;  %v1668_v14 = vld [vmem:[#allocation3 + $0x128] ss:$20 sps:$4 sm:$0xff]  }
 0x232   :  { %1566 = vmatpush3.bf16.msra.mxu1 %v1664_v5 }
 0x233   :  { %1567 = vmatprep.subr.bf16.mxu1 %v1813_v37 }
 0x234   :  { %1127 = vmatpush1.bf16.msra.mxu0 %v1889_v17 }
 0x235   :  { %1128 = vmatprep.subr.bf16.mxu0 %v1892_v18 }
 0x236   :  { %1568 = vmatpush3.bf16.msra.mxu1 %v1665_v8 }
 0x237   :  { %1569 = vmatprep.subr.bf16.mxu1 %v1813_v37 }
 0x238   :  { %1129 = vmatpush1.bf16.msra.mxu0 %v1901_v21 }
 0x239   :  { %1130 = vmatprep.subr.bf16.mxu0 %v1904_v22 }
 0x23a   :  { %1570 = vmatpush3.bf16.msra.mxu1 %v1666_v9 }
 0x23b   :  { %1571 = vmatprep.subr.bf16.mxu1 %v1813_v37 }
 0x23c   :  { %1131 = vmatpush1.bf16.msra.mxu0 %v1906_v23 }
 0x23d   :  { %1132 = vmatprep.subr.bf16.mxu0 %v1913_v26 }
 0x23e   :  { %1572 = vmatpush3.bf16.msra.mxu1 %v1667_v12 }
 0x23f   :  { %1573 = vmatprep.subr.bf16.mxu1 %v1813_v37 }
 0x240   :  { %1133 = vmatpush1.bf16.msra.mxu0 %v1922_v29 }
 0x241   :  { %1579 = vmatprep.subr.bf16.mxu0 %v1813_v37 }
 0x242   :  { %1574 = vmatpush3.bf16.msra.mxu1 %v1668_v14 }
 0x243   :  { %1161 = vmatprep.subr.bf16.mxu1 %v1857_v6 }
 0x2f6   :  { %v707_v17 = vpop.f32.mrb[4].mxu1  ;;  %v750_v18 = vpop.f32.mrb[8].mxu0 }
 0x2f7   :  { %v1452_v21 = vmul.f32 -1.442695, %v707_v17  ;;  %v709_v22 = vpop.f32.mrb[5].mxu1  ;;  %v752_v23 = vpop.f32.mrb[9].mxu0 }
 0x2f8   :  { %v1454_v26 = vmul.f32 -1.442695, %v709_v22  ;;  %v711_v29 = vpop.f32.mrb[6].mxu1  ;;  %v754_v49 = vpop.f32.mrb[10].mxu0  ;;  %v1456_v55 = vmul.f32 -1.442695, %v752_v23 }
 0x2f9   :  { %1713 = vpow2.f32 %v1452_v21  ;;  %v1453_v51 = vmul.f32 -1.442695, %v711_v29  ;;  %v713_v52 = vpop.f32.mrb[7].mxu1  ;;  %v756_v53 = vpop.f32.mrb[11].mxu0  ;;  %v1675_v22 = vld [vmem:[#allocation3 + $0x100] ss:$20 sps:$4 sm:$0xff]  }
 0x2fa   :  { %1715 = vpow2.f32 %v1454_v26  ;;  %v1455_v54 = vmul.f32 -1.442695, %v713_v52  ;;  %v1457_v58 = vmul.f32 -1.442695, %v756_v53  ;;  %v1676_v23 = vld [vmem:[#allocation3 + $0x128] ss:$20 sps:$4 sm:$0xff]  }
 0x2fb   :  { %1717 = vpow2.f32 %v1453_v51 }
 0x2fc   :  { %1719 = vpow2.f32 %v1455_v54 }
 0x2fd   :  { %1721 = vtanh.f32 %v750_v18 }
 0x2fe   :  { %1723 = vpow2.f32 %v1456_v55 }
 0x2ff   :  { %1725 = vtanh.f32 %v754_v49 }
 0x303   :  { %v1714_v56 = vpop.eup %1713 }
 0x304   :  { %v1716_v6 = vpop.eup %1715  ;;  %v765_v57 = vadd.f32 1.0, %v1714_v56 }
 0x305   :  { %v777_v59 = vadd.f32 1.0, %v1716_v6  ;;  %v1718_v60 = vpop.eup %1717 }
 0x306   :  { %1727 = vrcp.f32 %v765_v57  ;;  %v766_v61 = vadd.f32 1.0, %v1718_v60  ;;  %v1720_v62 = vpop.eup %1719 }
 0x307   :  { %1729 = vrcp.f32 %v777_v59  ;;  %v778_v63 = vadd.f32 1.0, %v1720_v62  ;;  %v1722_v34 = vpop.eup %1721 }
 0x308   :  { %1731 = vpow2.f32 %v1457_v58  ;;  %v1724_v36 = vpop.eup %1723 }
 0x309   :  { %1733 = vrcp.f32 %v766_v61  ;;  %v1726_v38 = vpop.eup %1725  ;;  %v791_v43 = vadd.f32 1.0, %v1724_v36 }
 0x30a   :  { %1735 = vrcp.f32 %v778_v63 }
 0x30b   :  { %1737 = vrcp.f32 %v791_v43 }
 0x310   :  { %v1728_v39 = vpop.eup %1727 }
 0x311   :  { %v1730_v40 = vpop.eup %1729  ;;  %v797_v41 = vmul.f32 %v1728_v39, %v1722_v34 }
 0x312   :  { %v1732_v44 = vpop.eup %1731  ;;  %v799_v45 = vmul.f32 %v1730_v40, %v1981_v50 }
 0x313   :  { %v1734_v1 = vpop.eup %1733  ;;  %v792_v2 = vadd.f32 1.0, %v1732_v44 }
 0x314   :  { %v798_v46 = vmul.f32 %v1734_v1, %v1726_v38  ;;  %v800_v47 = vadd.f32 %v799_v45, %v797_v41  ;;  %v1736_v48 = vpop.eup %1735 }
 0x315   :  { %v1738_v5 = vpop.eup %1737 }
 0x316   :  { %v801_v3 = vmul.f32 %v1736_v48, %v800_v47  ;;  %1739 = vtanh.f32 %v800_v47 }
 0x317   :  { %1741 = vrcp.f32 %v792_v2 }
 0x318   :  { %v2037_v4 = vadd.f32 %v801_v3, %v798_v46 }
 0x31a   :  { %1743 = vtanh.f32 %v2037_v4 }
 0x320   :  { %v1740_v8 = vpop.eup %1739 }
 0x321   :  { %v804_v9 = vmul.f32 %v1740_v8, %v1738_v5  ;;  %v1742_v12 = vpop.eup %1741 }
 0x323   :  { %v811_v50 = vadd.f32 %v804_v9, %v1928_v30 }
 0x324   :  { %v1744_v14 = vpop.eup %1743 }
 0x325   :  { %v807_v17 = vmul.f32 %v1744_v14, %v1742_v12 }
 0x327   :  { %v812_v18 = vadd.f32 %v807_v17, %v1933_v31 }
 0x329   :  { %v813_v21 = vpack.c.bf16 %v812_v18, %v811_v50 }
 0x32b   :  { %1576 = vmatmul.mubr.bf16.vlgmr.msra.gmra.mrb[8].mxu1 %v813_v21 }
 0x32c   :  { %1162 = vmatpush1.bf16.msra.mxu1 %v1859_v7  ;;  %1193 = vmatprep.mubr.bf16.mxu1 %v1812_v0 }
 0x32d   :  { %1163 = vmatprep.subr.bf16.mxu1 %v1868_v10 }
 0x330   :  { %1164 = vmatpush1.bf16.msra.mxu1 %v1871_v11 }
 0x331   :  { %1165 = vmatprep.subr.bf16.mxu1 %v1877_v13 }
 0x334   :  { %1166 = vmatpush1.bf16.msra.mxu1 %v1883_v15 }
 0x335   :  { %1167 = vmatprep.subr.bf16.mxu1 %v1886_v16 }
 0x338   :  { %1168 = vmatpush1.bf16.msra.mxu1 %v1895_v19 }
 0x339   :  { %1169 = vmatprep.subr.bf16.mxu1 %v1898_v20 }
 0x33c   :  { %1170 = vmatpush1.bf16.msra.mxu1 %v1909_v24 }
 0x33d   :  { %1171 = vmatprep.subr.bf16.mxu1 %v1911_v25 }
 0x340   :  { %1172 = vmatpush1.bf16.msra.mxu1 %v1917_v27  ;;  %v1669_v27 = vld [vmem:[#allocation3 + $0x10] ss:$20 sps:$4 sm:$0xff]  }
 0x341   :  { %1173 = vmatprep.subr.bf16.mxu1 %v1920_v28  ;;  %v1670_v28 = vld [vmem:[#allocation3 + $0x38] ss:$20 sps:$4 sm:$0xff]  }
 0x344   :  { %1174 = vmatpush1.bf16.msra.mxu1 %v1937_v32  ;;  %v1671_v32 = vld [vmem:[#allocation3 + $0x60] ss:$20 sps:$4 sm:$0xff]  }
 0x345   :  { %1175 = vmatprep.subr.bf16.mxu1 %v1940_v33  ;;  %v1672_v33 = vld [vmem:[#allocation3 + $0x88] ss:$20 sps:$4 sm:$0xff]  }
 0x348   :  { %1176 = vmatpush1.bf16.msra.mxu1 %v1947_v35  ;;  %v1673_v35 = vld [vmem:[#allocation3 + $0xb0] ss:$20 sps:$4 sm:$0xff]  }
 0x3fe   :  { %v912_v0 = vpop.f32.mrb[8].mxu1 }
 0x3ff   :  { %1745 = vtanh.f32 %v912_v0  ;;  %v1577_v7 = vpop.f32.mrb[9].mxu1 }
 0x400   :  { %v915_v10 = vpop.f32.mrb[10].mxu1 }
 0x401   :  { %1747 = vtanh.f32 %v915_v10  ;;  %v1578_v11 = vpop.f32.mrb[11].mxu1 }
 0x409   :  { %v1746_v13 = vpop.eup %1745 }
 0x40a   :  { %v921_v15 = vmul.f32 %v1746_v13, %v2005_v42 }
 0x40b   :  { %v1748_v16 = vpop.eup %1747 }
 0x40c   :  { %v922_v19 = vmul.f32 %v1748_v16, %v2005_v42  ;;  %v923_v20 = vadd.f32 %v921_v15, %v811_v50  ;;  %v1674_v42 = vld [vmem:[#allocation3 + $0xd8] ss:$20 sps:$4 sm:$0xff]  }
 0x40e   :  { %v924_v24 = vadd.f32 %v922_v19, %v812_v18 }
 0x410   :  { %v925_v25 = vpack.c.bf16 %v924_v24, %v923_v20 }
 0x412   :  { %1151 = vmatmul.mubr.bf16.vlgmr.msra.gmra.mrb[12].mxu0 %v925_v25  ;;  %1194 = vmatmul.mubr.bf16.vlgmr.msra.gmra.mrb[12].mxu1 %v925_v25 }
 0x413   :  { %1595 = vmatprep.mubr.msk.bf16.mxu0 %vm1814_vm0, %v1813_v37  ;;  %1580 = vmatpush3.bf16.msra.mxu0 %v1669_v27 }
 0x414   :  { %1581 = vmatprep.subr.bf16.mxu0 %v1813_v37 }
 0x417   :  { %1582 = vmatpush3.bf16.msra.mxu0 %v1670_v28 }
 0x418   :  { %1583 = vmatprep.subr.bf16.mxu0 %v1813_v37 }
 0x41b   :  { %1584 = vmatpush3.bf16.msra.mxu0 %v1671_v32 }
 0x41c   :  { %1585 = vmatprep.subr.bf16.mxu0 %v1813_v37 }
 0x41f   :  { %1586 = vmatpush3.bf16.msra.mxu0 %v1672_v33 }
 0x420   :  { %1587 = vmatprep.subr.bf16.mxu0 %v1813_v37 }
 0x423   :  { %1588 = vmatpush3.bf16.msra.mxu0 %v1673_v35 }
 0x424   :  { %1589 = vmatprep.subr.bf16.mxu0 %v1813_v37 }
 0x427   :  { %1590 = vmatpush3.bf16.msra.mxu0 %v1674_v42 }
 0x428   :  { %1591 = vmatprep.subr.bf16.mxu0 %v1813_v37 }
 0x42b   :  { %1592 = vmatpush3.bf16.msra.mxu0 %v1675_v22 }
 0x42c   :  { %1593 = vmatprep.subr.bf16.mxu0 %v1813_v37 }
 0x42f   :  { %1594 = vmatpush3.bf16.msra.mxu0 %v1676_v23 }
 0x4e5   :  { %v1152_v26 = vpop.f32.mrb[12].mxu0  ;;  %v1195_v29 = vpop.f32.mrb[12].mxu1 }
 0x4e6   :  { %v1498_v49 = vmul.f32 -1.442695, %v1152_v26  ;;  %v1154_v51 = vpop.f32.mrb[13].mxu0  ;;  %v1197_v52 = vpop.f32.mrb[13].mxu1 }
 0x4e7   :  { %v1500_v53 = vmul.f32 -1.442695, %v1154_v51  ;;  %v1156_v54 = vpop.f32.mrb[14].mxu0  ;;  %v1199_v55 = vpop.f32.mrb[14].mxu1  ;;  %v1502_v59 = vmul.f32 -1.442695, %v1197_v52 }
 0x4e8   :  { %1749 = vpow2.f32 %v1498_v49  ;;  %v1499_v56 = vmul.f32 -1.442695, %v1156_v54  ;;  %v1158_v6 = vpop.f32.mrb[15].mxu0  ;;  %v1201_v57 = vpop.f32.mrb[15].mxu1 }
 0x4e9   :  { %1751 = vpow2.f32 %v1500_v53  ;;  %v1501_v58 = vmul.f32 -1.442695, %v1158_v6  ;;  %v1503_v62 = vmul.f32 -1.442695, %v1201_v57 }
 0x4ea   :  { %1753 = vpow2.f32 %v1499_v56 }
 0x4eb   :  { %1755 = vpow2.f32 %v1501_v58 }
 0x4ec   :  { %1757 = vtanh.f32 %v1195_v29 }
 0x4ed   :  { %1759 = vpow2.f32 %v1502_v59 }
 0x4ee   :  { %1761 = vtanh.f32 %v1199_v55 }
 0x4f2   :  { %v1750_v60 = vpop.eup %1749 }
 0x4f3   :  { %v1752_v37 = vpop.eup %1751  ;;  %v1210_v61 = vadd.f32 1.0, %v1750_v60 }
 0x4f4   :  { %v1222_v63 = vadd.f32 1.0, %v1752_v37  ;;  %v1754_v34 = vpop.eup %1753 }
 0x4f5   :  { %1763 = vrcp.f32 %v1210_v61  ;;  %v1211_v36 = vadd.f32 1.0, %v1754_v34  ;;  %v1756_v38 = vpop.eup %1755 }
 0x4f6   :  { %1765 = vrcp.f32 %v1222_v63  ;;  %v1223_v39 = vadd.f32 1.0, %v1756_v38  ;;  %v1758_v40 = vpop.eup %1757 }
 0x4f7   :  { %1767 = vpow2.f32 %v1503_v62  ;;  %v1760_v41 = vpop.eup %1759 }
 0x4f8   :  { %1769 = vrcp.f32 %v1211_v36  ;;  %v1762_v43 = vpop.eup %1761  ;;  %v1236_v46 = vadd.f32 1.0, %v1760_v41 }
 0x4f9   :  { %1771 = vrcp.f32 %v1223_v39 }
 0x4fa   :  { %1773 = vrcp.f32 %v1236_v46 }
 0x4ff   :  { %v1764_v44 = vpop.eup %1763 }
 0x500   :  { %v1766_v45 = vpop.eup %1765  ;;  %v1242_v1 = vmul.f32 %v1764_v44, %v1758_v40 }
 0x501   :  { %v1768_v47 = vpop.eup %1767  ;;  %v1244_v48 = vmul.f32 %v1766_v45, %v2037_v4 }
 0x502   :  { %v1770_v2 = vpop.eup %1769  ;;  %v1237_v9 = vadd.f32 1.0, %v1768_v47 }
 0x503   :  { %v1243_v3 = vmul.f32 %v1770_v2, %v1762_v43  ;;  %v1245_v5 = vadd.f32 %v1244_v48, %v1242_v1  ;;  %v1772_v8 = vpop.eup %1771 }
 0x504   :  { %v1774_v17 = vpop.eup %1773 }
 0x505   :  { %v1246_v12 = vmul.f32 %v1772_v8, %v1245_v5  ;;  %1775 = vtanh.f32 %v1245_v5 }
 0x506   :  { %1777 = vrcp.f32 %v1237_v9 }
 0x507   :  { %v1247_v14 = vadd.f32 %v1246_v12, %v1243_v3 }
 0x509   :  { %1779 = vtanh.f32 %v1247_v14 }
 0x50f   :  { %v1776_v50 = vpop.eup %1775 }
 0x510   :  { %v1249_v18 = vmul.f32 %v1776_v50, %v1774_v17  ;;  %v1778_v21 = vpop.eup %1777 }
 0x512   :  { %v1256_v10 = vadd.f32 %v1249_v18, %v1928_v30 }
 0x513   :  { %v1780_v0 = vpop.eup %1779 }
 0x514   :  { %v1252_v7 = vmul.f32 %v1780_v0, %v1778_v21 }
 0x516   :  { %v1257_v4 = vadd.f32 %v1252_v7, %v1933_v31 }
 0x518   :  { %v1258_v11 = vpack.c.bf16 %v1257_v4, %v1256_v10 }
 0x51a   :  { %1596 = vmatmul.mubr.bf16.vlgmr.msra.gmra.mrb[16].mxu0 %v1258_v11 }
 0x5ed   :  { %v1357_v13 = vpop.f32.mrb[16].mxu0 }
 0x5ee   :  { %1781 = vtanh.f32 %v1357_v13  ;;  %v1597_v15 = vpop.f32.mrb[17].mxu0 }
 0x5ef   :  { %v1360_v16 = vpop.f32.mrb[18].mxu0 }
 0x5f0   :  { %1783 = vtanh.f32 %v1360_v16  ;;  %v1598_v19 = vpop.f32.mrb[19].mxu0 }
 0x5f8   :  { %v1782_v20 = vpop.eup %1781 }
 0x5f9   :  { %1366 = vst [vmem:[%s2080_s2] sm:$0xff] %v1782_v20 }
 0x5fa   :  { %v1784_v24 = vpop.eup %1783 }
 0x5fb   :  { %1367 = vst [vmem:[%s2080_s2 + $0x8] sm:$0xff] %v1784_v24 }
 0x5fc   :  { %1372 = vsyncpa [#allocation4], 1 }

</bundles_post_ra>
